<compile_context>
chip_gen: v6e
topology: v6e:2x2x1
jax: 0.10.0
libtpu: 0.0.40
codegen_flags: <defaults>
</compile_context>

<pallas_src>
import jax
import jax.numpy as jnp
from jax.experimental import pallas as pl
from jax.experimental.pallas import tpu as pltpu


def _round_up(x, m):
    return ((x + m - 1) // m) * m


def _cdiv(a, b):
    return (a + b - 1) // b


def _mlp_ac_kernel(x_ref, w_sh_ref, b_sh_ref, w_h_ref, b_h_ref,
                   w_o_ref, b_o_ref, out_ref):
    bf16 = jnp.bfloat16

    # shared linear; the ReLU heading both branches is applied once here.
    h = jnp.dot(x_ref[...].astype(bf16), w_sh_ref[...],
                preferred_element_type=jnp.float32)
    h = jnp.maximum(h + b_sh_ref[...], 0.0)

    # fused actor/critic hidden layers: one (hidden, 2*hidden) matmul.
    hc = jnp.dot(h.astype(bf16), w_h_ref[...],
                 preferred_element_type=jnp.float32)
    hc = jnp.maximum(hc + b_h_ref[...], 0.0)

    # fused block-diagonal output heads, zero-padded to lane-dense 128 width.
    out = jnp.dot(hc.astype(bf16), w_o_ref[...],
                  preferred_element_type=jnp.float32)
    out_ref[...] = (out + b_o_ref[...]).astype(out_ref.dtype)


def fuse_params(params, compute_dtype=jnp.bfloat16):
    """Build the fused / padded / bf16 weights ONCE (hoisted out of forward).

    Returns a dict of fused tensors plus static metadata (n_actions, dims).
    """
    obs_dim, hidden = params["w_sh"].shape
    n_actions = params["w_a2"].shape[1]
    n_out = n_actions + 1
    out_dim = _round_up(max(n_out, 128), 128)  # lane-dense padded head width

    # hidden layer of both branches side by side: (hidden, 2*hidden)
    w_h = jnp.concatenate([params["w_a1"], params["w_c1"]], axis=1)
    b_h = jnp.concatenate([params["b_a1"], params["b_c1"]], axis=1)

    # block-diagonal fused output head, zero-padded to out_dim lanes:
    #   [a1 | c1] @ [[w_a2, 0], [0, w_c2], ...pad] + [b_a2, b_c2, 0...]
    w_o = jnp.zeros((2 * hidden, out_dim), jnp.float32)
    w_o = w_o.at[:hidden, :n_actions].set(params["w_a2"])
    w_o = w_o.at[hidden:, n_actions:n_out].set(params["w_c2"])
    b_o = jnp.zeros((1, out_dim), jnp.float32)
    b_o = b_o.at[:, :n_actions].set(params["b_a2"][0])
    b_o = b_o.at[:, n_actions:n_out].set(params["b_c2"][0])

    return dict(
        # dot operands in bf16 (MXU native); biases stay fp32 (VPU epilogue).
        w_sh=params["w_sh"].astype(compute_dtype), b_sh=params["b_sh"],
        w_h=w_h.astype(compute_dtype), b_h=b_h,
        w_o=w_o.astype(compute_dtype), b_o=b_o,
        obs_dim=int(obs_dim), hidden=int(hidden),
        n_actions=int(n_actions), out_dim=int(out_dim),
    )


def _choose_batch_tiling(B, tile_b):
    """Balanced batch tiling: minimize padding, >=2 grid steps when possible."""
    n_tiles = max(_cdiv(B, tile_b), 2 if B > 8 else 1)
    tb = _round_up(_cdiv(B, n_tiles), 8)
    b_pad = _round_up(B, tb)
    return tb, b_pad


def mlp_ac_forward(x, fused, tile_b=4096):
    """Actor-critic MLP forward in a single batch-tiled Pallas kernel.

    x: (B, obs_dim) float32
    fused: output of fuse_params(params)
    Returns (actor (B, n_actions) f32, critic (B, 1) f32).
    """
    B, obs_dim = x.shape
    assert obs_dim == fused["obs_dim"]
    hidden = fused["hidden"]
    n_actions = fused["n_actions"]
    n_out = n_actions + 1
    out_dim = fused["out_dim"]

    tb, b_pad = _choose_batch_tiling(B, tile_b)
    if b_pad != B:
        x = jnp.pad(x, ((0, b_pad - B), (0, 0)))
    grid = (b_pad // tb,)

    # weights/biases stay resident across all grid iterations
    def _resident(shape):
        return pl.BlockSpec(shape, lambda i: (0, 0))

    flops = 2 * b_pad * (obs_dim * hidden
                         + hidden * 2 * hidden
                         + 2 * hidden * out_dim)
    bytes_accessed = (4 * b_pad * obs_dim                       # x (f32)
                      + 2 * (obs_dim * hidden                   # weights (bf16)
                             + hidden * 2 * hidden
                             + 2 * hidden * out_dim)
                      + 4 * (hidden + 2 * hidden + out_dim)     # biases (f32)
                      + 2 * b_pad * out_dim)                    # out (bf16)

    # NOTE: per review, do NOT zero-pad obs_dim to 128 (it would 8x the x HBM
    # stream for ~3% of FLOPs). If the short-row x DMA ever shows up, deepen
    # its pipeline with pipeline_mode=pl.Buffered(3) on the x BlockSpec.
    out = pl.pallas_call(
        _mlp_ac_kernel,
        out_shape=jax.ShapeDtypeStruct((b_pad, out_dim), jnp.bfloat16),
        grid_spec=pltpu.PrefetchScalarGridSpec(
            num_scalar_prefetch=0,
            grid=grid,
            in_specs=[
                pl.BlockSpec((tb, obs_dim), lambda i: (i, 0)),
                _resident((obs_dim, hidden)),
                _resident((1, hidden)),
                _resident((hidden, 2 * hidden)),
                _resident((1, 2 * hidden)),
                _resident((2 * hidden, out_dim)),
                _resident((1, out_dim)),
            ],
            out_specs=pl.BlockSpec((tb, out_dim), lambda i: (i, 0)),
        ),
        compiler_params=pltpu.CompilerParams(
            dimension_semantics=("parallel",),
            # raise v5e's 16 MiB scoped-VMEM default; well under v7x's 64 MiB.
            vmem_limit_bytes=48 * 1024 * 1024,
        ),
        cost_estimate=pl.CostEstimate(
            flops=flops, transcendentals=0, bytes_accessed=bytes_accessed),
    )(x, fused["w_sh"], fused["b_sh"], fused["w_h"], fused["b_h"],
      fused["w_o"], fused["b_o"])

    # slice padded lanes / padded batch rows off outside the kernel; upcast.
    actor = out[:B, :n_actions].astype(jnp.float32)
    critic = out[:B, n_actions:n_out].astype(jnp.float32)
    return actor, critic


def init_params(key, obs_dim, n_actions, hidden_dim=128):
    """Deterministic synthetic parameters (shapes match nn.Linear layers)."""
    keys = jax.random.split(key, 10)

    def lin(kw, kb, fan_in, fan_out):
        bound = 1.0 / jnp.sqrt(fan_in)
        w = jax.random.uniform(kw, (fan_in, fan_out), jnp.float32, -bound, bound)
        b = jax.random.uniform(kb, (1, fan_out), jnp.float32, -bound, bound)
        return w, b

    w_sh, b_sh = lin(keys[0], keys[1], obs_dim, hidden_dim)
    w_a1, b_a1 = lin(keys[2], keys[3], hidden_dim, hidden_dim)
    w_a2, b_a2 = lin(keys[4], keys[5], hidden_dim, n_actions)
    w_c1, b_c1 = lin(keys[6], keys[7], hidden_dim, hidden_dim)
    w_c2, b_c2 = lin(keys[8], keys[9], hidden_dim, 1)
    return dict(
        w_sh=w_sh, b_sh=b_sh,
        w_a1=w_a1, b_a1=b_a1,
        w_a2=w_a2, b_a2=b_a2,
        w_c1=w_c1, b_c1=b_c1,
        w_c2=w_c2, b_c2=b_c2,
    )


def reference_forward(x, p):
    """Plain-JAX fp32 reference mirroring the PyTorch module."""
    hr = jnp.maximum(x @ p["w_sh"] + p["b_sh"], 0.0)
    a = jnp.maximum(hr @ p["w_a1"] + p["b_a1"], 0.0) @ p["w_a2"] + p["b_a2"]
    c = jnp.maximum(hr @ p["w_c1"] + p["b_c1"], 0.0) @ p["w_c2"] + p["b_c2"]
    return a, c


def reference_forward_bf16(x, p):
    """Reference with the same bf16-operand / fp32-accumulate recipe as the kernel."""
    bf16 = jnp.bfloat16

    def mm(a, w):
        return jnp.dot(a.astype(bf16), w.astype(bf16),
                       preferred_element_type=jnp.float32)

    hr = jnp.maximum(mm(x, p["w_sh"]) + p["b_sh"], 0.0)
    a = mm(jnp.maximum(mm(hr, p["w_a1"]) + p["b_a1"], 0.0), p["w_a2"]) + p["b_a2"]
    c = mm(jnp.maximum(mm(hr, p["w_c1"]) + p["b_c1"], 0.0), p["w_c2"]) + p["b_c2"]
    return a, c


if __name__ == "__main__":
    key = jax.random.PRNGKey(0)
    k_x, k_p = jax.random.split(key)

    batch = 8
    obs_dim = 16
    n_actions = 8
    hidden_dim = 128

    x = jax.random.normal(k_x, (batch, obs_dim), jnp.float32)
    params = init_params(k_p, obs_dim, n_actions, hidden_dim)
    fused = fuse_params(params)  # built once, reused for every forward

    actor_out, critic_out = mlp_ac_forward(x, fused)
    jax.block_until_ready((actor_out, critic_out))

    assert actor_out.shape == (batch, n_actions)
    assert critic_out.shape == (batch, 1)
    # tight check vs a reference using the same bf16-operand recipe
    rba, rbc = reference_forward_bf16(x, params)
    assert jnp.allclose(actor_out, rba, atol=1e-2, rtol=1e-2)
    assert jnp.allclose(critic_out, rbc, atol=1e-2, rtol=1e-2)
    # loose sanity check vs the fp32 PyTorch-equivalent reference
    rfa, rfc = reference_forward(x, params)
    assert jnp.allclose(actor_out, rfa, atol=5e-2, rtol=5e-2)
    assert jnp.allclose(critic_out, rfc, atol=5e-2, rtol=5e-2)

    # larger, non-aligned batch to exercise balanced tiling / multi-step grid
    xb = jax.random.normal(k_x, (1037, obs_dim), jnp.float32)
    a_big, c_big = mlp_ac_forward(xb, fused)
    jax.block_until_ready((a_big, c_big))
    assert a_big.shape == (1037, n_actions) and c_big.shape == (1037, 1)
    rba, rbc = reference_forward_bf16(xb, params)
    assert jnp.allclose(a_big, rba, atol=1e-2, rtol=1e-2)
    assert jnp.allclose(c_big, rbc, atol=1e-2, rtol=1e-2)
    rfa, rfc = reference_forward(xb, params)
    assert jnp.allclose(a_big, rfa, atol=5e-2, rtol=5e-2)
    assert jnp.allclose(c_big, rfc, atol=5e-2, rtol=5e-2)

    print("KERNEL_OK")
</pallas_src>

<mosaic_0001>
module attributes {stable_mosaic.version = 11 : i64} {
  func.func @_mlp_ac_kernel(%arg0: i32, %arg1: memref<8x16xf32, #tpu.memory_space<vmem>>, %arg2: memref<16x128xbf16, #tpu.memory_space<vmem>>, %arg3: memref<1x128xf32, #tpu.memory_space<vmem>>, %arg4: memref<128x256xbf16, #tpu.memory_space<vmem>>, %arg5: memref<1x256xf32, #tpu.memory_space<vmem>>, %arg6: memref<256x128xbf16, #tpu.memory_space<vmem>>, %arg7: memref<1x128xf32, #tpu.memory_space<vmem>>, %arg8: memref<8x128xbf16, #tpu.memory_space<vmem>>) attributes {dimension_semantics = [#tpu.dimension_semantics<parallel>], iteration_bounds = array<i64: 1>, scalar_prefetch = 0 : i64, scratch_operands = 0 : i64, tpu.core_type = #tpu.core_type<tc>, window_params = [{transform_indices = @transform_0, window_bounds = array<i64: 8, 16>}, {pipeline_mode = #tpu.pipeline_mode<synchronous>, transform_indices = @transform_1, window_bounds = array<i64: 16, 128>}, {pipeline_mode = #tpu.pipeline_mode<synchronous>, transform_indices = @transform_2, window_bounds = array<i64: 1, 128>}, {pipeline_mode = #tpu.pipeline_mode<synchronous>, transform_indices = @transform_3, window_bounds = array<i64: 128, 256>}, {pipeline_mode = #tpu.pipeline_mode<synchronous>, transform_indices = @transform_4, window_bounds = array<i64: 1, 256>}, {pipeline_mode = #tpu.pipeline_mode<synchronous>, transform_indices = @transform_5, window_bounds = array<i64: 256, 128>}, {pipeline_mode = #tpu.pipeline_mode<synchronous>, transform_indices = @transform_6, window_bounds = array<i64: 1, 128>}, {transform_indices = @transform_7, window_bounds = array<i64: 8, 128>}]} {
    %c0 = arith.constant 0 : index
    %c0_0 = arith.constant 0 : index
    %0 = vector.load %arg1[%c0, %c0_0] : memref<8x16xf32, #tpu.memory_space<vmem>>, vector<8x16xf32>
    %1 = arith.truncf %0 : vector<8x16xf32> to vector<8x16xbf16>
    %c0_1 = arith.constant 0 : index
    %c0_2 = arith.constant 0 : index
    %2 = vector.load %arg2[%c0_1, %c0_2] : memref<16x128xbf16, #tpu.memory_space<vmem>>, vector<16x128xbf16>
    %cst = arith.constant dense<0.000000e+00> : vector<8x128xf32>
    %3 = tpu.matmul %1, %2, %cst {dimension_numbers = #tpu.dot_dimension_numbers<[1], [0], [0], [1], [0, 0, 1, 1], [], []>} : vector<8x16xbf16>, vector<16x128xbf16>, vector<8x128xf32> -> vector<8x128xf32>
    %c0_3 = arith.constant 0 : index
    %c0_4 = arith.constant 0 : index
    %4 = vector.load %arg3[%c0_3, %c0_4] : memref<1x128xf32, #tpu.memory_space<vmem>>, vector<1x128xf32>
    %5 = vector.broadcast %4 : vector<1x128xf32> to vector<8x128xf32>
    %6 = arith.addf %3, %5 : vector<8x128xf32>
    %cst_5 = arith.constant 0.000000e+00 : f32
    %7 = vector.broadcast %cst_5 : f32 to vector<8x128xf32>
    %8 = arith.maximumf %6, %7 : vector<8x128xf32>
    %9 = arith.truncf %8 : vector<8x128xf32> to vector<8x128xbf16>
    %c0_6 = arith.constant 0 : index
    %c0_7 = arith.constant 0 : index
    %10 = vector.load %arg4[%c0_6, %c0_7] : memref<128x256xbf16, #tpu.memory_space<vmem>>, vector<128x256xbf16>
    %cst_8 = arith.constant dense<0.000000e+00> : vector<8x256xf32>
    %11 = tpu.matmul %9, %10, %cst_8 {dimension_numbers = #tpu.dot_dimension_numbers<[1], [0], [0], [1], [0, 0, 1, 1], [], []>} : vector<8x128xbf16>, vector<128x256xbf16>, vector<8x256xf32> -> vector<8x256xf32>
    %c0_9 = arith.constant 0 : index
    %c0_10 = arith.constant 0 : index
    %12 = vector.load %arg5[%c0_9, %c0_10] : memref<1x256xf32, #tpu.memory_space<vmem>>, vector<1x256xf32>
    %13 = vector.broadcast %12 : vector<1x256xf32> to vector<8x256xf32>
    %14 = arith.addf %11, %13 : vector<8x256xf32>
    %cst_11 = arith.constant 0.000000e+00 : f32
    %15 = vector.broadcast %cst_11 : f32 to vector<8x256xf32>
    %16 = arith.maximumf %14, %15 : vector<8x256xf32>
    %17 = arith.truncf %16 : vector<8x256xf32> to vector<8x256xbf16>
    %c0_12 = arith.constant 0 : index
    %c0_13 = arith.constant 0 : index
    %18 = vector.load %arg6[%c0_12, %c0_13] : memref<256x128xbf16, #tpu.memory_space<vmem>>, vector<256x128xbf16>
    %cst_14 = arith.constant dense<0.000000e+00> : vector<8x128xf32>
    %19 = tpu.matmul %17, %18, %cst_14 {dimension_numbers = #tpu.dot_dimension_numbers<[1], [0], [0], [1], [0, 0, 1, 1], [], []>} : vector<8x256xbf16>, vector<256x128xbf16>, vector<8x128xf32> -> vector<8x128xf32>
    %c0_15 = arith.constant 0 : index
    %c0_16 = arith.constant 0 : index
    %20 = vector.load %arg7[%c0_15, %c0_16] : memref<1x128xf32, #tpu.memory_space<vmem>>, vector<1x128xf32>
    %21 = vector.broadcast %20 : vector<1x128xf32> to vector<8x128xf32>
    %22 = arith.addf %19, %21 : vector<8x128xf32>
    %23 = arith.truncf %22 : vector<8x128xf32> to vector<8x128xbf16>
    %c0_17 = arith.constant 0 : index
    %c0_18 = arith.constant 0 : index
    %24 = vector.load %arg8[%c0_17, %c0_18] : memref<8x128xbf16, #tpu.memory_space<vmem>>, vector<8x128xbf16>
    tpu.vector_store %arg8[%c0_17, %c0_18], %23 {strides = array<i32>} : memref<8x128xbf16, #tpu.memory_space<vmem>>, vector<8x128xbf16>,
    return
  }
  func.func @transform_0(%arg0: i32) -> (i32, i32) {
    %c0_i32 = arith.constant 0 : i32
    %c0_i32_0 = arith.constant 0 : i32
    return %arg0, %c0_i32 : i32, i32
  }
  func.func @transform_1(%arg0: i32) -> (i32, i32) {
    %c0_i32 = arith.constant 0 : i32
    %c0_i32_0 = arith.constant 0 : i32
    %c0_i32_1 = arith.constant 0 : i32
    return %c0_i32, %c0_i32_0 : i32, i32
  }
  func.func @transform_2(%arg0: i32) -> (i32, i32) {
    %c0_i32 = arith.constant 0 : i32
    %c0_i32_0 = arith.constant 0 : i32
    %c0_i32_1 = arith.constant 0 : i32
    return %c0_i32, %c0_i32_0 : i32, i32
  }
  func.func @transform_3(%arg0: i32) -> (i32, i32) {
    %c0_i32 = arith.constant 0 : i32
    %c0_i32_0 = arith.constant 0 : i32
    %c0_i32_1 = arith.constant 0 : i32
    return %c0_i32, %c0_i32_0 : i32, i32
  }
  func.func @transform_4(%arg0: i32) -> (i32, i32) {
    %c0_i32 = arith.constant 0 : i32
    %c0_i32_0 = arith.constant 0 : i32
    %c0_i32_1 = arith.constant 0 : i32
    return %c0_i32, %c0_i32_0 : i32, i32
  }
  func.func @transform_5(%arg0: i32) -> (i32, i32) {
    %c0_i32 = arith.constant 0 : i32
    %c0_i32_0 = arith.constant 0 : i32
    %c0_i32_1 = arith.constant 0 : i32
    return %c0_i32, %c0_i32_0 : i32, i32
  }
  func.func @transform_6(%arg0: i32) -> (i32, i32) {
    %c0_i32 = arith.constant 0 : i32
    %c0_i32_0 = arith.constant 0 : i32
    %c0_i32_1 = arith.constant 0 : i32
    return %c0_i32, %c0_i32_0 : i32, i32
  }
  func.func @transform_7(%arg0: i32) -> (i32, i32) {
    %c0_i32 = arith.constant 0 : i32
    %c0_i32_0 = arith.constant 0 : i32
    return %arg0, %c0_i32 : i32, i32
  }
}

</mosaic_0001>

<bundles_post_ra>
// kernel: tpu_custom_call.1
= control target key start
LH: loop header
LB: loop body
LE: loop exit
PB: predicated region body
PF: predicated region fallthrough
CT: control target
= control target key end

     0   :  { %12 = vsyncpa [#allocation3], 0  ;;  %s800_s0 = inlined_call_operand.hbm [shape: f32[8,16], index: 0, kind: input, shape index: {}]   ;;  %s801_s1 = inlined_call_operand.hbm [shape: bf16[16,128], index: 1, kind: input, shape index: {}]   ;;  %s802_s2 = inlined_call_operand.vmem [shape: f32[1,128], index: 2, kind: input, shape index: {}]   ;;  %s803_s3 = inlined_call_operand.hbm [shape: bf16[128,256], index: 3, kind: input, shape index: {}]   ;;  %s804_s4 = inlined_call_operand.vmem [shape: f32[1,256], index: 4, kind: input, shape index: {}]   ;;  %s805_s5 = inlined_call_operand.hbm [shape: bf16[256,128], index: 5, kind: input, shape index: {}]   ;;  %s806_s6 = inlined_call_operand.vmem [shape: f32[1,128], index: 6, kind: input, shape index: {}]   ;;  %s807_s7 = inlined_call_operand.hbm [shape: bf16[8,128], index: 7, kind: output, shape index: {}]  }
   0x1   :  { %13 = vsyncpa [#allocation6], 0 }
   0x2   :  { %14 = vsyncpa [#allocation9], 0 }
   0x3   :  { %15 = vsyncpa [#allocation4], 0  ;;  %s718_s24 = smov [#allocation5]  }
   0x4   :  { %s31_s25 = sshll.u32 %s718_s24, 4  ;;  %s32_s25 = int_to_ptr.vmem [resolvable:$true] %s31_s25 }
   0x5   :  { %s618_s26 = scalar_lea.vmem %s32_s25, 128  ;;  %p623_p1 = scmp.lt.s32.totalorder %s32_s25, %s32_s25 }
   0x6   :  { %p619_p0 = scmp.ne.s32.totalorder %s32_s25, %s618_s26  ;;  %p624_p2 = scmp.lt.s32.totalorder %s618_s26, %s618_s26 }
   0x8   :  { %p625_p3 = por %p624_p2, %p623_p1 }
   0xa   :  { %p626_p4 = pnand %p625_p3, %p619_p0 }
   0xc   :  { %629 = shalt.err (!%p626_p4)
}
   0xd   :  { %s719_s27 = smov 64   ;;  %s720_s28 = smov 4  }
   0xe   :  { %37 = dma.hbm_to_vmem [thread:$0]  %s801_s1, 128, %s32_s25, [#allocation6], %s719_s27, %s719_s27, %s720_s28  }
   0xf   :  { %s721_s8 = smov [#allocation2]   ;;  %s722_s10 = smov [#allocation7]  }
  0x10   :  { %s22_s9 = sshll.u32 %s721_s8, 4  ;;  %s45_s11 = sshll.u32 %s722_s10, 4  ;;  %s23_s9 = int_to_ptr.vmem [resolvable:$true] %s22_s9  ;;  %s46_s11 = int_to_ptr.vmem [resolvable:$true] %s45_s11 }
  0x11   :  { %s638_s12 = scalar_lea.vmem %s23_s9, 128  ;;  %p643_p6 = scmp.lt.s32.totalorder %s23_s9, %s23_s9 }
  0x12   :  { %p639_p5 = scmp.ne.s32.totalorder %s23_s9, %s638_s12  ;;  %p644_p7 = scmp.lt.s32.totalorder %s638_s12, %s638_s12 }
  0x14   :  { %p645_p8 = por %p644_p7, %p643_p6 }
  0x16   :  { %p646_p9 = pnand %p645_p8, %p639_p5 }
  0x18   :  { %649 = shalt.err (!%p646_p9)
}
  0x19   :  { %25 = dma.hbm_to_vmem [thread:$0]  %s800_s0, 128, %s23_s9, [#allocation3]  }
  0x1a   :  { %s658_s15 = scalar_lea.vmem %s46_s11, 2048  ;;  %p663_p11 = scmp.lt.s32.totalorder %s46_s11, %s46_s11 }
  0x1b   :  { %p659_p10 = scmp.ne.s32.totalorder %s46_s11, %s658_s15  ;;  %p664_p12 = scmp.lt.s32.totalorder %s658_s15, %s658_s15 }
  0x1d   :  { %p665_p13 = por %p664_p12, %p663_p11 }
  0x1f   :  { %p666_p0 = pnand %p665_p13, %p659_p10 }
  0x21   :  { %669 = shalt.err (!%p666_p0)
}
  0x22   :  { %s723_s1 = smov 128   ;;  %s724_s16 = smov 8  }
  0x23   :  { %51 = dma.hbm_to_vmem [thread:$0]  %s803_s3, 2048, %s46_s11, [#allocation6], %s723_s1, %s723_s1, %s724_s16  }
  0x24   :  { %s725_s19 = smov [#allocation8]  }
  0x25   :  { %s59_s20 = sshll.u32 %s725_s19, 4  ;;  %s60_s20 = int_to_ptr.vmem [resolvable:$true] %s59_s20 }
  0x26   :  { %s678_s21 = scalar_lea.vmem %s60_s20, 2048  ;;  %p683_p2 = scmp.lt.s32.totalorder %s60_s20, %s60_s20 }
  0x27   :  { %p679_p1 = scmp.ne.s32.totalorder %s60_s20, %s678_s21  ;;  %p684_p3 = scmp.lt.s32.totalorder %s678_s21, %s678_s21 }
  0x29   :  { %p685_p4 = por %p684_p3, %p683_p2 }
  0x2b   :  { %p686_p5 = pnand %p685_p4, %p679_p1 }
  0x2d   :  { %689 = shalt.err (!%p686_p5)
}
  0x2e   :  { %65 = dma.hbm_to_vmem [thread:$0]  %s805_s5, 2048, %s60_s20, [#allocation9], %s719_s27, %s719_s27, %s720_s28  }
  0x2f   :  { %710 = dma.done.wait [#allocation3], 128  }
  0x30   :  { %711 = vsyncadd [#allocation3], 4294967168 }
  0x31   :  { %712 = dma.done.wait [#allocation6], 2176  }
  0x32   :  { %713 = vsyncadd [#allocation6], 4294965120 }
  0x33   :  { %714 = dma.done.wait [#allocation9], 2048  }
  0x34   :  { %715 = vsyncadd [#allocation9], 4294965248  ;;  %v726_v0 = vmov 0.0   ;;  %vm727_vm0 = vmmov 0   ;;  %v569_v1 = vld [vmem:[#allocation5] sm:$0xff]   ;;  %v81_v2 = vld [vmem:[#allocation2] sm:$0xff]  ;;  %v162_v45 = vlaneseq }
  0x35   :  { %551 = vmatprep.subr.bf16.mxu0 %v726_v0  ;;  %553 = vmatprep.mubr.msk.bf16.mxu0 %vm727_vm0, %v726_v0  ;;  %v82_v3 = vpack.c.bf16 %v81_v2, %v81_v2  ;;  %vm98_vm1 = vcmask 130048   ;;  %v570_v4 = vld [vmem:[#allocation7 + $0x74] ss:$8 sps:$4 sm:$0xff]   ;;  %v572_v5 = vld [vmem:[#allocation7 + $0x70] ss:$8 sps:$4 sm:$0xff]   ;;  %v728_v20 = vmov 0  }
  0x36   :  { %552 = vmatpush3.bf16.msra.mxu0 %v569_v1  ;;  %v573_v6 = vld [vmem:[#allocation7 + $0x64] ss:$8 sps:$4 sm:$0xff]   ;;  %252 = vmatprep.subr.bf16.mxu1 %v570_v4  ;;  %v575_v7 = vld [vmem:[#allocation7 + $0x60] ss:$8 sps:$4 sm:$0xff]   ;;  %v576_v8 = vld [vmem:[#allocation7 + $0x54] ss:$8 sps:$4 sm:$0xff]  }
  0x37   :  { %253 = vmatpush1.bf16.msra.mxu1 %v572_v5  ;;  %v578_v9 = vld [vmem:[#allocation7 + $0x50] ss:$8 sps:$4 sm:$0xff]   ;;  %v579_v10 = vld [vmem:[#allocation7 + $0x44] ss:$8 sps:$4 sm:$0xff]   ;;  %v581_v11 = vld [vmem:[#allocation7 + $0x40] ss:$8 sps:$4 sm:$0xff]   ;;  %284 = vmatprep.mubr.bf16.mxu1 %v728_v20 }
  0x38   :  { %254 = vmatprep.subr.bf16.mxu1 %v573_v6  ;;  %v582_v12 = vld [vmem:[#allocation7 + $0x34] ss:$8 sps:$4 sm:$0xff]   ;;  %v584_v13 = vld [vmem:[#allocation7 + $0x30] ss:$8 sps:$4 sm:$0xff]   ;;  %v585_v14 = vld [vmem:[#allocation7 + $0x24] ss:$8 sps:$4 sm:$0xff]  }
  0x39   :  { %554 = vmatmul.mubr.msk.bf16.vlgmr.msra.gmra.mxu0 %vm98_vm1, %v82_v3  ;;  %v587_v15 = vld [vmem:[#allocation7 + $0x20] ss:$8 sps:$4 sm:$0xff]   ;;  %v588_v16 = vld [vmem:[#allocation7 + $0x14] ss:$8 sps:$4 sm:$0xff]   ;;  %v590_v17 = vld [vmem:[#allocation7 + $0x10] ss:$8 sps:$4 sm:$0xff]  }
  0x3a   :  { %v591_v18 = vld [vmem:[#allocation7 + $0x4] ss:$8 sps:$4 sm:$0xff]   ;;  %v593_v19 = vld [vmem:[#allocation7] ss:$8 sps:$4 sm:$0xff]   ;;  %v594_v21 = vld [vmem:[#allocation8 + $0x78] sm:$0xff]   ;;  %v163_v46 = vshrl.u32 %v162_v45, 7 }
  0x3b   :  { %255 = vmatpush1.bf16.msra.mxu1 %v575_v7  ;;  %v595_v22 = vld [vmem:[#allocation8 + $0x38] sm:$0xff]   ;;  %v596_v23 = vld [vmem:[#allocation8 + $0x70] sm:$0xff]   ;;  %529 = vmatprep.subr.bf16.mxu0 %v594_v21  ;;  %v598_v25 = vld [vmem:[#allocation8 + $0x68] sm:$0xff]  }
  0x3c   :  { %256 = vmatprep.subr.bf16.mxu1 %v576_v8  ;;  %530 = vmatpush3.bf16.msra.mxu0 %v595_v22  ;;  %v597_v24 = vld [vmem:[#allocation8 + $0x30] sm:$0xff]   ;;  %v599_v26 = vld [vmem:[#allocation8 + $0x28] sm:$0xff]   ;;  %v600_v27 = vld [vmem:[#allocation8 + $0x60] sm:$0xff]   ;;  %v164_v47 = vsub.s32 0, %v163_v46  ;;  %v168_v49 = vsub.s32 1, %v163_v46 }
  0x3d   :  { %531 = vmatprep.subr.bf16.mxu0 %v596_v23  ;;  %v601_v28 = vld [vmem:[#allocation8 + $0x20] sm:$0xff]   ;;  %v602_v29 = vld [vmem:[#allocation8 + $0x58] sm:$0xff]   ;;  %v604_v31 = vld [vmem:[#allocation8 + $0x50] sm:$0xff]  }
  0x3e   :  { %v603_v30 = vld [vmem:[#allocation8 + $0x18] sm:$0xff]   ;;  %v605_v32 = vld [vmem:[#allocation8 + $0x10] sm:$0xff]   ;;  %v606_v41 = vld [vmem:[#allocation8 + $0x48] sm:$0xff]  }
  0x3f   :  { %257 = vmatpush1.bf16.msra.mxu1 %v578_v9  ;;  %v491_v33 = vld [vmem:[%s802_s2] ss:$0 sm:$0xff]  ;;  %v607_v42 = vld [vmem:[#allocation8 + $0x8] sm:$0xff]   ;;  %v608_v43 = vld [vmem:[#allocation8 + $0x40] sm:$0xff]  }
  0x40   :  { %258 = vmatprep.subr.bf16.mxu1 %v579_v10  ;;  %532 = vmatpush3.bf16.msra.mxu0 %v597_v24  ;;  %v609_v44 = vld [vmem:[#allocation8] sm:$0xff]   ;;  %v160_v48 = vld [vmem:[%s804_s4] sm:$0x3]  ;;  %s729_s4 = smov [#allocation10]  }
  0x41   :  { %533 = vmatprep.subr.bf16.mxu0 %v598_v25  ;;  %v165_v50 = vrot.slane %v160_v48, %v164_v47  ;;  %v169_v51 = vrot.slane %v160_v48, %v168_v49  ;;  %v510_v63 = vld [vmem:[%s806_s6] ss:$0 sm:$0xff]  ;;  %s480_s26 = sshll.u32 %s729_s4, 4  ;;  %s481_s26 = int_to_ptr.vmem [resolvable:$true] %s480_s26 }
  0x42   :  { %s690_s27 = scalar_lea.vmem %s481_s26, 64  ;;  %p695_p7 = scmp.lt.s32.totalorder %s481_s26, %s481_s26 }
  0x43   :  { %259 = vmatpush1.bf16.msra.mxu1 %v581_v11  ;;  %p691_p6 = scmp.ne.s32.totalorder %s481_s26, %s690_s27  ;;  %p696_p8 = scmp.lt.s32.totalorder %s690_s27, %s690_s27 }
  0x44   :  { %260 = vmatprep.subr.bf16.mxu1 %v582_v12  ;;  %534 = vmatpush3.bf16.msra.mxu0 %v599_v26 }
  0x45   :  { %535 = vmatprep.subr.bf16.mxu0 %v600_v27  ;;  %p697_p9 = por %p696_p8, %p695_p7 }
  0x47   :  { %261 = vmatpush1.bf16.msra.mxu1 %v584_v13  ;;  %p698_p10 = pnand %p697_p9, %p691_p6 }
  0x48   :  { %262 = vmatprep.subr.bf16.mxu1 %v585_v14  ;;  %536 = vmatpush3.bf16.msra.mxu0 %v601_v28 }
  0x49   :  { %537 = vmatprep.subr.bf16.mxu0 %v602_v29 }
  0x4b   :  { %263 = vmatpush1.bf16.msra.mxu1 %v587_v15 }
  0x4c   :  { %264 = vmatprep.subr.bf16.mxu1 %v588_v16  ;;  %538 = vmatpush3.bf16.msra.mxu0 %v603_v30 }
  0x4d   :  { %539 = vmatprep.subr.bf16.mxu0 %v604_v31 }
  0x4f   :  { %265 = vmatpush1.bf16.msra.mxu1 %v590_v17 }
  0x50   :  { %266 = vmatprep.subr.bf16.mxu1 %v591_v18  ;;  %540 = vmatpush3.bf16.msra.mxu0 %v605_v32 }
  0x51   :  { %541 = vmatprep.subr.bf16.mxu0 %v606_v41 }
  0x53   :  { %267 = vmatpush1.bf16.msra.mxu1 %v593_v19 }
  0x54   :  { %542 = vmatpush3.bf16.msra.mxu0 %v607_v42 }
  0x55   :  { %543 = vmatprep.subr.bf16.mxu0 %v608_v43 }
  0x58   :  { %544 = vmatpush3.bf16.msra.mxu0 %v609_v44 }
  0xf9   :  { %v136_v34 = vpop.f32.mrf.mxu0 }
  0xfa   :  { %v137_v35 = vadd.f32 %v491_v33, %v136_v34 }
  0xfb   :  { %v555_v36 = vpop.f32.mrf.mxu0 }
  0xfc   :  { %v142_v37 = vmax.f32 %v137_v35, 0.0 }
  0xfd   :  { %v139_v38 = vpop.f32.mrf.mxu0 }
  0xfe   :  { %v143_v39 = vpack.c.bf16 %v142_v37, %v142_v37 }
  0xff   :  { %v556_v40 = vpop.f32.mrf.mxu0 }
 0x100   :  { %285 = vmatmul.mubr.bf16.vlgmr.msra.gmra.mxu1 %v143_v39 }
 0x1c0   :  { %v286_v52 = vpop.f32.mrf.mxu1 }
 0x1c1   :  { %v287_v53 = vadd.f32 %v286_v52, %v165_v50 }
 0x1c2   :  { %v288_v54 = vpop.f32.mrf.mxu1 }
 0x1c3   :  { %v289_v55 = vadd.f32 %v288_v54, %v169_v51  ;;  %v293_v56 = vmax.f32 %v287_v53, 0.0 }
 0x1c4   :  { %v290_v57 = vpop.f32.mrf.mxu1 }
 0x1c5   :  { %v294_v58 = vmax.f32 %v289_v55, 0.0  ;;  %v295_v61 = vpack.c.bf16 %v293_v56, %v293_v56 }
 0x1c6   :  { %v291_v59 = vpop.f32.mrf.mxu1 }
 0x1c7   :  { %v296_v60 = vpack.c.bf16 %v294_v58, %v294_v58 }
 0x1c9   :  { %464 = vmatprep.mubr.bf16.mxu0 %v296_v60 }
 0x1ca   :  { %465 = vmatmul.mubr.bf16.vlgmr.msra.gmra.mxu0 %v295_v61 }
 0x28a   :  { %v545_v62 = vpop.f32.mrf.mxu0 }
 0x28c   :  { %v546_v0 = vpop.f32.mrf.mxu0 }
 0x28d   :  { %v547_v1 = vadd.f32 %v546_v0, %v545_v62 }
 0x28e   :  { %v548_v2 = vpop.f32.mrf.mxu0 }
 0x28f   :  { %v467_v3 = vadd.f32 %v547_v1, %v510_v63 }
 0x290   :  { %v549_v4 = vpop.f32.mrf.mxu0 }
 0x291   :  { %v472_v5 = vpack.c.bf16 %v467_v3, %v467_v3 }
 0x293   :  { %473 = vst [vmem:[#allocation10] sm:$0xf] %v472_v5 }
 0x294   :  { %701 = shalt.err (!%p698_p10)
}
 0x295   :  { %483 = dma.vmem_to_hbm [thread:$0]  %s481_s26, 64, %s807_s7, [#allocation4]  }
 0x296   :  { %716 = dma.done.wait [#allocation4], 64  }
 0x297   :  { %717 = vsyncadd [#allocation4], 4294967232 }
 0x298   :  { %487 = vsyncpa [#allocation3], 1 }
 0x299   :  { %488 = vsyncpa [#allocation6], 1 }
 0x29a   :  { %489 = vsyncpa [#allocation9], 1 }
 0x29b   :  { %490 = vsyncpa [#allocation4], 1 }

</bundles_post_ra>
